<compile_context>
chip_gen: v7x
topology: tpu7x:2x2x1
jax: 0.10.0
libtpu: 0.0.40
codegen_flags: <defaults>
</compile_context>

<pallas_src>
import functools

import numpy as np
import jax
import jax.numpy as jnp
from jax import lax
from jax.experimental import pallas as pl
from jax.experimental.pallas import tpu as pltpu


def _fill_halo(pad_ref, x_ref, *, oy, ox, H, W, Hp, Wp, pad_val):
    """Write the interior once and pad only the four halo border strips."""
    dtype = pad_ref.dtype
    TP = x_ref.shape[0]
    pad_ref[:, oy:oy + H, ox:ox + W] = x_ref[...]
    if oy > 0:
        pad_ref[:, :oy, :] = jnp.full((TP, oy, Wp), pad_val, dtype)
    if Hp > oy + H:
        pad_ref[:, oy + H:, :] = jnp.full((TP, Hp - oy - H, Wp), pad_val, dtype)
    if ox > 0:
        pad_ref[:, :, :ox] = jnp.full((TP, Hp, ox), pad_val, dtype)
    if Wp > ox + W:
        pad_ref[:, :, ox + W:] = jnp.full((TP, Hp, Wp - ox - W), pad_val, dtype)


def _sliding_max(v, k, axis):
    """Sliding max with window k along `axis` via log-doubling (exact)."""
    w = 1
    L = v.shape[axis]
    while w < k:
        s = min(w, k - w)
        lo = lax.slice_in_dim(v, 0, L - s, axis=axis)
        hi = lax.slice_in_dim(v, s, L, axis=axis)
        v = jnp.maximum(lo, hi)
        L -= s
        w += s
    return v


def _dilation_flat_kernel(x_ref, out_ref, pad_ref, *, kh, kw, oy, ox, H, W, pad_val):
    """Flat SE (neighborhood identically 0): dilation == separable sliding max."""
    Hp, Wp = H + kh - 1, W + kw - 1
    _fill_halo(pad_ref, x_ref, oy=oy, ox=ox, H=H, W=W, Hp=Hp, Wp=Wp, pad_val=pad_val)
    v = pad_ref[...]                     # (TP, Hp, Wp)
    v = _sliding_max(v, kh, axis=1)      # rows (sublane shifts) -> (TP, H, Wp)
    v = _sliding_max(v, kw, axis=2)      # cols (lane shifts)    -> (TP, H, W)
    out_ref[...] = v


def _dilation_general_kernel(x_ref, out_ref, pad_ref, *, neigh_flip, oy, ox, H, W,
                             pad_val):
    """General path: masked kernels and/or non-flat structuring elements.

    Exact: all kh*kw terms are kept (they can matter near geodesic borders);
    the '+ neigh' add is skipped only where the neighborhood value is literally
    0.0. Arithmetic stays in the input dtype (matches the reference)."""
    kh, kw = len(neigh_flip), len(neigh_flip[0])
    dtype = out_ref.dtype
    Hp, Wp = H + kh - 1, W + kw - 1
    _fill_halo(pad_ref, x_ref, oy=oy, ox=ox, H=H, W=W, Hp=Hp, Wp=Wp, pad_val=pad_val)

    acc = None
    for i in range(kh):
        row_i = pad_ref[:, i:i + H, :]           # one load per kernel row
        for j in range(kw):
            v = row_i[:, :, j:j + W]
            nv = float(neigh_flip[i][j])
            if nv != 0.0:
                v = v + jnp.asarray(nv, dtype=dtype)
            acc = v if acc is None else jnp.maximum(acc, v)
    out_ref[...] = acc.astype(dtype)


def dilation_pallas(image, kernel, structuring_element=None, origin=None,
                    border_type="geodesic", border_value=0.0, max_val=10000.0,
                    vmem_budget_bytes=None):
    """Dilation with the same defaults / semantics as the PyTorch module."""
    kernel = np.asarray(kernel)
    if image.ndim != 4:
        raise ValueError(f"Input must be [B, C, H, W]. Got shape {image.shape}")
    if kernel.ndim != 2:
        raise ValueError(f"Kernel must be 2-D. Got shape {kernel.shape}")

    B, C, H, W = image.shape
    kh, kw = kernel.shape
    if origin is None:
        origin = [kh // 2, kw // 2]
    oy, ox = int(origin[0]), int(origin[1])
    Hp, Wp = H + kh - 1, W + kw - 1

    if border_type == "geodesic":
        pad_val = -float(max_val)
    elif border_type == "constant":
        pad_val = float(border_value)
    else:
        # TODO(synk): reflect/replicate F.pad border modes are not implemented.
        raise NotImplementedError(f"border_type '{border_type}' not supported")

    if structuring_element is None:
        neigh = np.where(kernel == 0, -float(max_val), 0.0)
    else:
        se = np.asarray(structuring_element, dtype=np.float64)
        neigh = np.where(kernel == 0, -float(max_val), se)
    neigh_flip = neigh[::-1, ::-1]
    flat = bool(np.all(neigh_flip == 0.0))

    # Collapse (B, C) -> planes; dilation never mixes planes.
    P = B * C
    x = image.reshape(P, H, W)

    # ---- generation-aware VMEM budgeting ----
    try:
        info = pltpu.get_tpu_info()
        vmem_cap = int(getattr(info, "vmem_capacity_bytes", 64 * 1024 * 1024))
    except Exception:
        vmem_cap = 64 * 1024 * 1024                      # conservative (v7x per-TC)
    if vmem_budget_bytes is None:
        vmem_budget_bytes = max(4 * 1024 * 1024, vmem_cap // 4)

    itemsize = image.dtype.itemsize
    # Per-plane footprint: double-buffered in + out blocks, halo scratch, live temps.
    plane_bytes = itemsize * (4 * H * W + 3 * Hp * Wp)
    tp_max = max(1, int(vmem_budget_bytes // max(plane_bytes, 1)))

    # Planes per grid step: largest divisor of P that fits the budget while still
    # leaving >= min(P, 8) grid steps (pipelining + both v7x TensorCores).
    min_steps = min(P, 8)
    TP = 1
    for d in range(1, P + 1):
        if P % d == 0 and d <= tp_max and (P // d) >= min_steps:
            TP = d
    grid = (P // TP,)
    # TODO(synk): tile over H with a (kh-1)-row halo for planes larger than the
    # VMEM budget (esp. v7x), instead of whole-plane blocks.
    # TODO(synk): for W << 128, lane-pack several image rows per 128-lane register
    # row so the in/out blocks (and all vector ops) are lane-dense.

    if flat:
        body = functools.partial(_dilation_flat_kernel, kh=kh, kw=kw, oy=oy, ox=ox,
                                 H=H, W=W, pad_val=pad_val)
    else:
        body = functools.partial(
            _dilation_general_kernel,
            neigh_flip=tuple(tuple(float(v) for v in row) for row in neigh_flip),
            oy=oy, ox=ox, H=H, W=W, pad_val=pad_val)

    vmem_limit = int(min(vmem_cap * 3 // 4, 100 * 1024 * 1024))

    out = pl.pallas_call(
        body,
        out_shape=jax.ShapeDtypeStruct((P, H, W), image.dtype),
        grid=grid,
        in_specs=[pl.BlockSpec((TP, H, W), lambda p: (p, 0, 0))],
        out_specs=pl.BlockSpec((TP, H, W), lambda p: (p, 0, 0)),
        scratch_shapes=[pltpu.VMEM((TP, Hp, Wp), image.dtype)],
        compiler_params=pltpu.CompilerParams(
            dimension_semantics=("parallel",),
            vmem_limit_bytes=vmem_limit),
    )(x)
    return out.reshape(B, C, H, W)


# ------------------- pure-JAX reference (correctness check) -----------------
def _ref_dilation(image, kernel, structuring_element=None, origin=None,
                  border_type="geodesic", border_value=0.0, max_val=10000.0):
    kernel = np.asarray(kernel)
    B, C, H, W = image.shape
    kh, kw = kernel.shape
    if origin is None:
        origin = [kh // 2, kw // 2]
    oy, ox = origin
    pad_val = -float(max_val) if border_type == "geodesic" else float(border_value)
    xp = jnp.pad(image, ((0, 0), (0, 0), (oy, kh - 1 - oy), (ox, kw - 1 - ox)),
                 constant_values=pad_val)
    if structuring_element is None:
        neigh = np.where(kernel == 0, -float(max_val), 0.0)
    else:
        neigh = np.where(kernel == 0, -float(max_val),
                         np.asarray(structuring_element, dtype=np.float64))
    neigh_flip = neigh[::-1, ::-1]
    vals = []
    for i in range(kh):
        for j in range(kw):
            vals.append(xp[..., i:i + H, j:j + W] + float(neigh_flip[i, j]))
    return jnp.max(jnp.stack(vals, 0), 0)


if __name__ == "__main__":
    key = jax.random.PRNGKey(0)
    # Small NCHW shapes consistent with the module contract.
    x = jax.random.uniform(key, (2, 4, 16, 16), dtype=jnp.float32)

    # 1) Default case: flat 3x3 structuring element (separable sliding-max path).
    se_flat3 = np.ones((3, 3), dtype=np.float32)
    out = jax.block_until_ready(dilation_pallas(x, se_flat3))
    ref = _ref_dilation(x, se_flat3)
    np.testing.assert_allclose(np.asarray(out), np.asarray(ref), rtol=1e-5, atol=1e-5)

    # 2) Masked (cross-shaped) kernel exercises the exact general path.
    se_cross = np.array([[0, 1, 0], [1, 1, 1], [0, 1, 0]], dtype=np.float32)
    out2 = jax.block_until_ready(dilation_pallas(x, se_cross))
    ref2 = _ref_dilation(x, se_cross)
    np.testing.assert_allclose(np.asarray(out2), np.asarray(ref2), rtol=1e-5, atol=1e-5)

    # 3) Flat 5x5 exercises the log-doubling sliding max (1 -> 2 -> 4 -> 5).
    se_flat5 = np.ones((5, 5), dtype=np.float32)
    out3 = jax.block_until_ready(dilation_pallas(x, se_flat5))
    ref3 = _ref_dilation(x, se_flat5)
    np.testing.assert_allclose(np.asarray(out3), np.asarray(ref3), rtol=1e-5, atol=1e-5)

    # 4) Non-flat structuring element with a constant border (general path + adds).
    se_vals = (0.01 * np.arange(9, dtype=np.float32)).reshape(3, 3)
    out4 = jax.block_until_ready(
        dilation_pallas(x, se_flat3, structuring_element=se_vals,
                        border_type="constant", border_value=0.0))
    ref4 = _ref_dilation(x, se_flat3, structuring_element=se_vals,
                         border_type="constant", border_value=0.0)
    np.testing.assert_allclose(np.asarray(out4), np.asarray(ref4), rtol=1e-5, atol=1e-5)

    print("KERNEL_OK")
</pallas_src>

<mosaic_0001>
module attributes {stable_mosaic.version = 11 : i64} {
  func.func @_dilation_flat_kernel(%arg0: i32, %arg1: memref<1x16x16xf32, #tpu.memory_space<vmem>>, %arg2: memref<1x16x16xf32, #tpu.memory_space<vmem>>, %arg3: memref<1x18x18xf32, #tpu.memory_space<vmem>>) attributes {dimension_semantics = [#tpu.dimension_semantics<parallel>], iteration_bounds = array<i64: 8>, scalar_prefetch = 0 : i64, scratch_operands = 1 : i64, tpu.core_type = #tpu.core_type<tc>, window_params = [{transform_indices = @transform_0, window_bounds = array<i64: 1, 16, 16>}, {transform_indices = @transform_1, window_bounds = array<i64: 1, 16, 16>}]} {
    %c0 = arith.constant 0 : index
    %c0_0 = arith.constant 0 : index
    %c0_1 = arith.constant 0 : index
    %0 = vector.load %arg1[%c0, %c0_0, %c0_1] : memref<1x16x16xf32, #tpu.memory_space<vmem>>, vector<1x16x16xf32>
    %c0_2 = arith.constant 0 : index
    %c1 = arith.constant 1 : index
    %c1_3 = arith.constant 1 : index
    %1 = vector.load %arg3[%c0_2, %c1, %c1_3] : memref<1x18x18xf32, #tpu.memory_space<vmem>>, vector<1x16x16xf32>
    tpu.vector_store %arg3[%c0_2, %c1, %c1_3], %0 {strides = array<i32>} : memref<1x18x18xf32, #tpu.memory_space<vmem>>, vector<1x16x16xf32>,
    %cst = arith.constant -1.000000e+04 : f32
    %2 = vector.broadcast %cst : f32 to vector<1x1x18xf32>
    %c0_4 = arith.constant 0 : index
    %c0_5 = arith.constant 0 : index
    %c0_6 = arith.constant 0 : index
    %3 = vector.load %arg3[%c0_4, %c0_5, %c0_6] : memref<1x18x18xf32, #tpu.memory_space<vmem>>, vector<1x1x18xf32>
    tpu.vector_store %arg3[%c0_4, %c0_5, %c0_6], %2 {strides = array<i32>} : memref<1x18x18xf32, #tpu.memory_space<vmem>>, vector<1x1x18xf32>,
    %cst_7 = arith.constant -1.000000e+04 : f32
    %4 = vector.broadcast %cst_7 : f32 to vector<1x1x18xf32>
    %c0_8 = arith.constant 0 : index
    %c17 = arith.constant 17 : index
    %c0_9 = arith.constant 0 : index
    %5 = vector.load %arg3[%c0_8, %c17, %c0_9] : memref<1x18x18xf32, #tpu.memory_space<vmem>>, vector<1x1x18xf32>
    tpu.vector_store %arg3[%c0_8, %c17, %c0_9], %4 {strides = array<i32>} : memref<1x18x18xf32, #tpu.memory_space<vmem>>, vector<1x1x18xf32>,
    %cst_10 = arith.constant -1.000000e+04 : f32
    %6 = vector.broadcast %cst_10 : f32 to vector<1x18x1xf32>
    %c0_11 = arith.constant 0 : index
    %c0_12 = arith.constant 0 : index
    %c0_13 = arith.constant 0 : index
    %7 = vector.load %arg3[%c0_11, %c0_12, %c0_13] : memref<1x18x18xf32, #tpu.memory_space<vmem>>, vector<1x18x1xf32>
    tpu.vector_store %arg3[%c0_11, %c0_12, %c0_13], %6 {strides = array<i32>} : memref<1x18x18xf32, #tpu.memory_space<vmem>>, vector<1x18x1xf32>,
    %cst_14 = arith.constant -1.000000e+04 : f32
    %8 = vector.broadcast %cst_14 : f32 to vector<1x18x1xf32>
    %c0_15 = arith.constant 0 : index
    %c0_16 = arith.constant 0 : index
    %c17_17 = arith.constant 17 : index
    %9 = vector.load %arg3[%c0_15, %c0_16, %c17_17] : memref<1x18x18xf32, #tpu.memory_space<vmem>>, vector<1x18x1xf32>
    tpu.vector_store %arg3[%c0_15, %c0_16, %c17_17], %8 {strides = array<i32>} : memref<1x18x18xf32, #tpu.memory_space<vmem>>, vector<1x18x1xf32>,
    %c0_18 = arith.constant 0 : index
    %c0_19 = arith.constant 0 : index
    %c0_20 = arith.constant 0 : index
    %10 = vector.load %arg3[%c0_18, %c0_19, %c0_20] : memref<1x18x18xf32, #tpu.memory_space<vmem>>, vector<1x18x18xf32>
    %11 = vector.extract_strided_slice %10 {offsets = [0, 0, 0], sizes = [1, 17, 18], strides = [1, 1, 1]} : vector<1x18x18xf32> to vector<1x17x18xf32>
    %12 = vector.extract_strided_slice %10 {offsets = [0, 1, 0], sizes = [1, 17, 18], strides = [1, 1, 1]} : vector<1x18x18xf32> to vector<1x17x18xf32>
    %13 = arith.maximumf %11, %12 : vector<1x17x18xf32>
    %14 = vector.extract_strided_slice %13 {offsets = [0, 0, 0], sizes = [1, 16, 18], strides = [1, 1, 1]} : vector<1x17x18xf32> to vector<1x16x18xf32>
    %15 = vector.extract_strided_slice %13 {offsets = [0, 1, 0], sizes = [1, 16, 18], strides = [1, 1, 1]} : vector<1x17x18xf32> to vector<1x16x18xf32>
    %16 = arith.maximumf %14, %15 : vector<1x16x18xf32>
    %17 = vector.extract_strided_slice %16 {offsets = [0, 0, 0], sizes = [1, 16, 17], strides = [1, 1, 1]} : vector<1x16x18xf32> to vector<1x16x17xf32>
    %18 = vector.extract_strided_slice %16 {offsets = [0, 0, 1], sizes = [1, 16, 17], strides = [1, 1, 1]} : vector<1x16x18xf32> to vector<1x16x17xf32>
    %19 = arith.maximumf %17, %18 : vector<1x16x17xf32>
    %20 = vector.extract_strided_slice %19 {offsets = [0, 0, 0], sizes = [1, 16, 16], strides = [1, 1, 1]} : vector<1x16x17xf32> to vector<1x16x16xf32>
    %21 = vector.extract_strided_slice %19 {offsets = [0, 0, 1], sizes = [1, 16, 16], strides = [1, 1, 1]} : vector<1x16x17xf32> to vector<1x16x16xf32>
    %22 = arith.maximumf %20, %21 : vector<1x16x16xf32>
    %c0_21 = arith.constant 0 : index
    %c0_22 = arith.constant 0 : index
    %c0_23 = arith.constant 0 : index
    %23 = vector.load %arg2[%c0_21, %c0_22, %c0_23] : memref<1x16x16xf32, #tpu.memory_space<vmem>>, vector<1x16x16xf32>
    tpu.vector_store %arg2[%c0_21, %c0_22, %c0_23], %22 {strides = array<i32>} : memref<1x16x16xf32, #tpu.memory_space<vmem>>, vector<1x16x16xf32>,
    return
  }
  func.func @transform_0(%arg0: i32) -> (i32, i32, i32) {
    %c0_i32 = arith.constant 0 : i32
    %c0_i32_0 = arith.constant 0 : i32
    %c0_i32_1 = arith.constant 0 : i32
    return %arg0, %c0_i32, %c0_i32_0 : i32, i32, i32
  }
  func.func @transform_1(%arg0: i32) -> (i32, i32, i32) {
    %c0_i32 = arith.constant 0 : i32
    %c0_i32_0 = arith.constant 0 : i32
    %c0_i32_1 = arith.constant 0 : i32
    return %arg0, %c0_i32, %c0_i32_0 : i32, i32, i32
  }
}

</mosaic_0001>

<bundles_post_ra>
// kernel: tpu_custom_call.1
= control target key start
LH: loop header
LB: loop body
LE: loop exit
PB: predicated region body
PF: predicated region fallthrough
CT: control target
= control target key end

     0   :  { %6 = vsyncpa [#allocation4], 0  ;;  %s651_s0 = inlined_call_operand.hbm [shape: f32[8,16,16], index: 0, kind: input, shape index: {}]   ;;  %s652_s1 = inlined_call_operand.hbm [shape: f32[8,16,16], index: 1, kind: output, shape index: {}]  }
   0x1   :  { %8 = vsyncpa [#allocation4 + $0x1], 0 }
   0x2   :  { %9 = vsyncpa [#allocation5], 0 }
   0x3   :  { %11 = vsyncpa [#allocation5 + $0x1], 0  ;;  %s487_s6 = smov 0   ;;  %s489_s7 = smov 0  }
   0x4   :  { %s491_s8 = smov 0   ;;  %s493_s9 = smov 0  }
   0x5 LB: > { %s508_s10 = sadd.s32 4294967295, %s466_s9   ;;  %s301_s11 = sadd.s32 4294967294, %s466_s9   ;;  %s466_s9 = sphi %s493_s9, %s664_s9   ;;  %s462_s8 = sphi %s491_s8, %s663_s8   ;;  %s458_s7 = sphi %s489_s7, %s662_s7   ;;  %s454_s6 = sphi %s487_s6, %s661_s6  }
   0x6   : > { %s512_s12 = sadd.s32 1, %s466_s9   ;;  %s24_s13 = sadd.s32 1, %s462_s8 }
   0x7   : > { %s21_s14 = ssub.s32 %s466_s9, %s512_s12  ;;  %p31_p0 = scmp.ne.s32.totalorder %s462_s8, %s458_s7 }
   0x8   : > { %p22_p1 = scmp.eq.s32.totalorder %s21_s14, 0  ;;  %p32_p2 = scmp.eq.s32.totalorder %s466_s9, 0 }
   0x9   : > { %p37_p3 = scmp.ne.s32.totalorder %s458_s7, %s454_s6  ;;  %p38_p4 = scmp.eq.s32.totalorder %s508_s10, 0 }
   0xa   : > { %s524_s15 = scalar_select %p22_p1, %s462_s8, %s24_s13  }
   0xb   : > { %p526_p5 = por %p32_p2, %p31_p0  ;;  %p530_p6 = por %p38_p4, %p37_p3 }
   0xc   : > { %p61_p7 = scmp.eq.s32.totalorder %s508_s10, 7  ;;  %p67_p8 = scmp.eq.s32.totalorder %s301_s11, 7 }
   0xd   : > { %p329_p9 = scmp.lt.s32.totalorder %s466_s9, 8  ;;  %s87_s20 = sand.u32 1, %s462_s8  }
   0xe   : > { %p536_p10 = por %p61_p7, %p31_p0  ;;  %p540_p11 = por %p67_p8, %p37_p3 }
   0xf   : > { %s315_s21 = sshll.u32 %s466_s9, 8  ;;  %s304_s22 = sshll.u32 %s87_s20, 4 }
  0x10   : > { %s656_s18 = scalar_select %p536_p10, 1, 0 }
  0x11   : > { %s657_s19 = scalar_select %p540_p11, 1, 0 }
  0x12   : > { %s549_s25 = scalar_lea.hbm %s651_s0, %s315_s21  ;;  %s91_s26 = scalar_lea.vmem [#allocation3], %s304_s22 }
  0x13   : > { %s98_s27 = sshll.u32 %s91_s26, 4  ;;  %p553_p12 = pnand %p329_p9, %p526_p5  ;;  %s557_s27 = int_to_ptr.vmem [resolvable:$true] %s98_s27 }
  0x14   : > { %s559_s29 = scalar_lea.sflag [#allocation4], %s87_s20  ;;  %s370_s30 = scalar_lea.hbm %s549_s25, 256 }
  0x15   : > { %p371_p13 = scmp.ne.s32.totalorder %s549_s25, %s370_s30  ;;  %p372_p0 = pneg %p553_p12 }
  0x16   : > { %s375_s4 = scalar_lea.hbm %s651_s0, 2048  ;;  %p376_p3 = scmp.lt.u32.totalorder %s549_s25, %s651_s0 }
  0x17   : > { %p373_p1 = pnand %p372_p0, %p371_p13  ;;  %p377_p4 = scmp.lt.u32.totalorder %s375_s4, %s370_s30 }
  0x18   : > { %p379_p7 = scmp.lt.u32.totalorder %s370_s30, %s549_s25 }
  0x19   : > { %p374_p2 = pneg %p373_p1  ;;  %p378_p5 = por %p377_p4, %p376_p3 }
  0x1b   : > { %p380_p8 = por %p379_p7, %p378_p5 }
  0x1d   : > { %p381_p9 = pnand %p380_p8, %p374_p2 }
  0x1f   : > { %384 = shalt.err (!%p381_p9)
}
  0x20   : > { %s385_s13 = scalar_lea.vmem %s557_s27, 256  ;;  %s468_s14 = smov [#allocation3]  }
  0x21   : > { %p386_p13 = scmp.ne.s32.totalorder %s557_s27, %s385_s13  ;;  %s390_s16 = sshll.u32 %s468_s14, 4  ;;  %s391_s16 = int_to_ptr.vmem [resolvable:$false] %s390_s16 }
  0x22   : > { %s392_s20 = scalar_lea.vmem %s391_s16, 512  ;;  %p393_p10 = scmp.lt.s32.totalorder %s557_s27, %s391_s16 }
  0x23   : > { %p388_p1 = pnand %p386_p13, %p372_p0  ;;  %p394_p3 = scmp.lt.s32.totalorder %s392_s20, %s385_s13 }
  0x25   : > { %p389_p11 = pneg %p388_p1  ;;  %p395_p4 = por %p394_p3, %p393_p10 }
  0x27   : > { %p396_p5 = pnand %p395_p4, %p389_p11 }
  0x29   : > { %399 = shalt.err (!%p396_p5)
}
  0x2a   : > { %s469_s21 = smov 128   ;;  %s470_s22 = smov 8  }
  0x2b   : > { %324 = dma.hbm_to_vmem [thread:$0]  (!%p553_p12), %s549_s25, 256, %s557_s27, %s559_s29, %s469_s21, %s469_s21, %s470_s22  }
  0x2c   : > { %p307_p0 = scmp.ge.s32.totalorder %s466_s9, 1  ;;  %p106_p2 = scmp.lt.s32.totalorder %s466_s9, 9 }
  0x2e   : > { %p107_p7 = pnand %p307_p0, %p106_p2 }
  0x2f   : > { %s590_s23 = sand.u32 (!%p107_p7), 1, %s458_s7  }
  0x30   : > { %110 = sbr.rel (%p107_p7) target bundleno = 451 (0x1c3), region = 24  ;;  %s308_s24 = sshll.u32 (!%p107_p7), %s590_s23, 4 }
  0x31   : > { %s113_s26 = scalar_lea.sflag (!%p107_p7), [#allocation4], %s590_s23  ;;  %s116_s30 = scalar_lea.vmem (!%p107_p7), [#allocation3], %s308_s24 }
  0x37   : > { %445 = dma.done.wait (%p530_p6), %s113_s26, 256  }
  0x38   : > { %447 = vsyncadd (%p530_p6), %s113_s26, 4294967040  ;;  %vm148_vm0 = vcmask 139264   ;;  %v471_v0 = vmov -10000.0   ;;  %v135_v1 = vld [vmem:[%s116_s30] sm:$0xff]  ;;  %s472_s25 = smov 1   ;;  %v136_v2 = vld [vmem:[%s116_s30 + $0x8] sm:$0xff] }
  0x39   : > { %149 = vst.msk [vmem:[#allocation2] sm:$0x1] %vm148_vm0, %v471_v0  ;;  %150 = vst.msk [vmem:[#allocation2 + $0x11] sm:$0x1] %vm148_vm0, %v471_v0  ;;  %139 = vrot.lane.b32.xlu0 %v135_v1, %s472_s25  ;;  %vm145_vm1 = vcmask 138248   ;;  %vm151_vm2 = vcmask 7168  }
  0x3a   : > { %vm156_vm3 = vcmask 146568   ;;  %vm154_vm4 = vcmask 1024   ;;  %vm159_vm5 = vcmask 140424   ;;  %vm167_vm6 = vcmask 1046528   ;;  %s473_s17 = smov 127   ;;  %s134_s27 = scalar_lea.vmem [#allocation6], %s308_s24 }
  0x3b   : > { %vm211_vm7 = vcmask 130048   ;;  %s228_s28 = sshll.u32 %s134_s27, 4  ;;  %s316_s29 = sshll.u32 %s508_s10, 8  ;;  %s603_s28 = int_to_ptr.vmem [resolvable:$true] %s228_s28 }
  0x3c   : > { %s608_s4 = scalar_lea.hbm %s652_s1, %s316_s29  ;;  %s215_s5 = scalar_lea.sflag [#allocation5], %s590_s23 }
  0x3d   : > { %141 = vrot.lane.b32.xlu0 %v136_v2, %s472_s25  ;;  %s400_s11 = scalar_lea.vmem %s603_s28, 256  ;;  %p659_p10 = scmp.ne.s32.totalorder %s656_s18, 0 }
  0x3e   : > { %p401_p6 = scmp.ne.s32.totalorder %s603_s28, %s400_s11  ;;  %s474_s10 = smov [#allocation6]  }
  0x3f   : > { %s404_s13 = sshll.u32 %s474_s10, 4  ;;  %s405_s13 = int_to_ptr.vmem [resolvable:$false] %s404_s13 }
  0x40   : > { %p402_p11 = pnand %p401_p6, %p659_p10  ;;  %s406_s14 = scalar_lea.vmem %s405_s13, 512 }
  0x41   : > { %p407_p8 = scmp.lt.s32.totalorder %s603_s28, %s405_s13  ;;  %p408_p9 = scmp.lt.s32.totalorder %s406_s14, %s400_s11 }
  0x42   : > { %p403_p12 = pneg %p402_p11 }
  0x43   : > { %p409_p13 = por %p408_p9, %p407_p8 }
  0x45   : > { %p410_p1 = pnand %p409_p13, %p403_p12 }
  0xab   : > { %v140_v3 = vpop.permute.xlu0 %139 }
  0xac   : > { %146 = vst.msk [vmem:[#allocation2 + $0x1] sm:$0xff] %vm145_vm1, %v140_v3 }
  0xad   : > { %152 = vst.msk [vmem:[#allocation2] sm:$0xff] %vm151_vm2, %v471_v0 }
  0xae   : > { %157 = vst.msk [vmem:[#allocation2] sm:$0xff] %vm156_vm3, %v471_v0 }
  0xaf   : > { %v142_v4 = vpop.permute.xlu0 %141 }
  0xb0   : > { %147 = vst.msk [vmem:[#allocation2 + $0x9] sm:$0xff] %vm145_vm1, %v142_v4 }
  0xb1   : > { %153 = vst.msk [vmem:[#allocation2 + $0x8] sm:$0xff] %vm151_vm2, %v471_v0 }
  0xb2   : > { %155 = vst.msk [vmem:[#allocation2 + $0x10] sm:$0x3] %vm154_vm4, %v471_v0 }
  0xb3   : > { %158 = vst.msk [vmem:[#allocation2 + $0x8] sm:$0xff] %vm156_vm3, %v471_v0 }
  0xb4   : > { %160 = vst.msk [vmem:[#allocation2 + $0x10] sm:$0x3] %vm159_vm5, %v471_v0 }
  0xb5   : > { %v161_v5 = vld [vmem:[#allocation2] sm:$0xff] }
  0xb6   : > { %v168_v6 = vrot.slane %v161_v5, 1 }
  0xba   : > { %v162_v7 = vld [vmem:[#allocation2 + $0x8] sm:$0xff] }
  0xbb   : > { %v163_v8 = vld [vmem:[#allocation2 + $0x10] sm:$0x3]  ;;  %v169_v9 = vrot.slane %v162_v7, 1 }
  0xbc   : > { %v171_v10 = vrot.slane %v163_v8, 1 }
  0xbd   : > { %v170_v11 = vsel %vm167_vm6, %v168_v6, %v169_v9 }
  0xbe   : > { %v172_v12 = vsel %vm167_vm6, %v169_v9, %v171_v10  ;;  %v178_v13 = vmax.f32 %v163_v8, %v171_v10  ;;  %v176_v14 = vmax.f32 %v161_v5, %v170_v11 }
  0xbf   : > { %v177_v15 = vmax.f32 %v162_v7, %v172_v12 }
  0xc0   : > { %v185_v16 = vrot.slane %v178_v13, 1  ;;  %v182_v17 = vrot.slane %v176_v14, 1 }
  0xc1   : > { %v183_v18 = vrot.slane %v177_v15, 1 }
  0xc3   : > { %v184_v19 = vsel %vm167_vm6, %v182_v17, %v183_v18  ;;  %v186_v20 = vsel %vm167_vm6, %v183_v18, %v185_v16 }
  0xc4   : > { %v189_v21 = vmax.f32 %v176_v14, %v184_v19  ;;  %v190_v22 = vmax.f32 %v177_v15, %v186_v20 }
  0xc6   : > { %193 = vrot.lane.b32.xlu1 %v189_v21, %s473_s17 }
  0xca   : > { %195 = vrot.lane.b32.xlu1 %v190_v22, %s473_s17 }
 0x138   : > { %v194_v23 = vpop.permute.xlu1 %193 }
 0x139   : > { %v199_v24 = vmax.f32 %v189_v21, %v194_v23 }
 0x13b   : > { %203 = vrot.lane.b32.xlu0 %v199_v24, %s473_s17 }
 0x13c   : > { %v196_v25 = vpop.permute.xlu1 %195 }
 0x13d   : > { %v200_v26 = vmax.f32 %v190_v22, %v196_v25 }
 0x13f   : > { %205 = vrot.lane.b32.xlu1 %v200_v26, %s473_s17 }
 0x1ad   : > { %v204_v27 = vpop.permute.xlu0 %203 }
 0x1ae   : > { %v209_v28 = vmax.f32 %v199_v24, %v204_v27 }
 0x1b0   : > { %212 = vst.msk [vmem:[%s134_s27] sm:$0xff] %vm211_vm7, %v209_v28 }
 0x1b1   : > { %v206_v29 = vpop.permute.xlu1 %205 }
 0x1b2   : > { %v210_v30 = vmax.f32 %v200_v26, %v206_v29 }
 0x1b4   : > { %213 = vst.msk [vmem:[%s134_s27 + $0x8] sm:$0xff] %vm211_vm7, %v210_v30 }
 0x1b5   : > { %413 = shalt.err (!%p410_p1)
}
 0x1b6   : > { %s414_s16 = scalar_lea.hbm %s608_s4, 256  ;;  %s418_s22 = scalar_lea.hbm %s652_s1, 2048 }
 0x1b7   : > { %p415_p3 = scmp.ne.s32.totalorder %s608_s4, %s414_s16  ;;  %p419_p0 = scmp.lt.u32.totalorder %s608_s4, %s652_s1 }
 0x1b8   : > { %p420_p2 = scmp.lt.u32.totalorder %s418_s22, %s414_s16  ;;  %p422_p6 = scmp.lt.u32.totalorder %s414_s16, %s608_s4 }
 0x1b9   : > { %p416_p4 = pnand %p415_p3, %p659_p10 }
 0x1ba   : > { %p421_p7 = por %p420_p2, %p419_p0 }
 0x1bb   : > { %p417_p5 = pneg %p416_p4 }
 0x1bc   : > { %p423_p11 = por %p422_p6, %p421_p7 }
 0x1be   : > { %p424_p12 = pnand %p423_p11, %p417_p5 }
 0x1c0   : > { %427 = shalt.err (!%p424_p12)
}
 0x1c1   : > { %s475_s30 = smov 128   ;;  %s476_s25 = smov 8  }
 0x1c2   : > { %319 = dma.vmem_to_hbm [thread:$0]  (%p659_p10), %s603_s28, 256, %s608_s4, %s215_s5, %s475_s30, %s475_s30, %s476_s25  }
 0x1c3 PF: > { %p330_p8 = scmp.ge.s32.totalorder %s466_s9, 2  ;;  %s243_s17 = sand.u32 1, %s454_s6  }
 0x1c4   : > { %p660_p9 = scmp.ne.s32.totalorder %s657_s19, 0  ;;  %s244_s27 = scalar_lea.sflag [#allocation5], %s243_s17 }
 0x1c6   : > { %p326_p13 = pnand %p330_p8, %p660_p9 }
 0x1c8   : > { %449 = dma.done.wait (!%p326_p13), %s244_s27, 256  }
 0x1c9   : > { %451 = vsyncadd (!%p326_p13), %s244_s27, 4294967040  ;;  %p14_p1 = scmp.ge.s32.totalorder %s512_s12, 10   ;;  %s661_s6 = smov %s458_s7 }
 0x1ca   : > { %s662_s7 = smov %s462_s8  ;;  %s663_s8 = smov %s524_s15 }
 0x1cb   : > { %s664_s9 = smov %s512_s12  ;;  %16 = sbr.rel (!%p14_p1) target bundleno = 5 (0x5), region = 69 }
 0x1d2   :  { %249 = vsyncpa [#allocation4], 1 }
 0x1d3   :  { %251 = vsyncpa [#allocation4 + $0x1], 1 }
 0x1d4   :  { %252 = vsyncpa [#allocation5], 1 }
 0x1d5   :  { %254 = vsyncpa [#allocation5 + $0x1], 1 }

</bundles_post_ra>
